<compile_context>
chip_gen: v6e
topology: v6e:2x2x1
jax: 0.10.0
libtpu: 0.0.40
codegen_flags: <defaults>
</compile_context>

<pallas_src>
import jax
import jax.numpy as jnp
from jax import lax
from jax.experimental import pallas as pl
from jax.experimental.pallas import tpu as pltpu

# Small, forward-consistent shapes (image-classifier style, scaled down).
C_IN = 4
H = 16
W = 16
HW = H * W                  # 256 -> lane-dense (multiple of 128)
K = 3                       # 3x3 conv, stride 1, SAME padding
C_OUT = 8
NUM_CLASSES = 10

assert (W & (W - 1)) == 0, "W must be a power of two for the mask bit-tricks"
W_LOG2 = W.bit_length() - 1

LANES = 128

# Stacked-tap scratch layout: tap t = kh*K+kw occupies rows [8t, 8t+C_IN) of a
# (TAP_ROWS, HW) bf16 buffer; all other rows are kept zero so the full-lane
# contraction dot(w1 (8,128), scratch (128,HW)) never picks up garbage.
TAP_SLOT = 8                          # 8-row-aligned slot per tap
TAP_DATA_ROWS = K * K * TAP_SLOT      # 72
TAP_ROWS = LANES                      # pad contraction to 128 (same MXU cost,
                                      # lets w1 be a clean full-lane row block)

# Packed-parameter buffer layout: one lane-padded (PACK_ROWS, 128) f32 buffer
# -> a single small DMA, reused across the whole batch grid.
#   rows 0..7   : w1 taps, lane 8*t + ci = w1[kh,kw,ci,co];  lane 72 = b1[co]
#                 (lanes >= 72 multiply zeroed scratch rows, so b1 parked there
#                  contributes nothing to the matmul)
#   rows 8..15  : w2 rows (lanes 0..NUM_CLASSES-1)
#   row  16     : b2       (lanes 0..NUM_CLASSES-1)
# Padding lanes/rows MUST stay zero: output lanes >= NUM_CLASSES are correct
# only because the w2/b2 padding lanes are zero-initialized.
W1_ROW0 = 0
B1_LANE = TAP_DATA_ROWS               # 72
W2_ROW0 = C_OUT                       # 8
B2_ROW = 2 * C_OUT                    # 16
PACK_ROWS = 24                        # multiple of 8 sublanes


def engine_kernel(x_ref, p_ref, o_ref, tap_ref):
    """Synthetic engine for one image of the batch grid.

    x_ref   : (C_IN, HW)        f32  image (channels on sublanes, flat spatial on lanes)
    p_ref   : (PACK_ROWS, 128)  f32  packed params (w1|b1 / w2 / b2), constant index_map
    o_ref   : (1, 128)          f32  lane-dense logits row (no sublane broadcast)
    tap_ref : (TAP_ROWS, HW)    bf16 stacked-tap scratch feeding one MXU matmul
    """
    x = x_ref[...]                                        # (C_IN, HW) f32

    # --- hoisted boundary masks (computed once, reused by every tap) ---------
    pos = lax.broadcasted_iota(jnp.int32, (C_IN, HW), 1)
    col = jnp.bitwise_and(pos, W - 1)                     # pos % W
    row = jnp.right_shift(pos, W_LOG2)                    # pos // W
    row_ok = {-1: row >= 1, 0: None, 1: row <= H - 2}
    col_ok = {-1: col >= 1, 0: None, 1: col <= W - 2}

    # Zero the scratch so pad rows (8t+C_IN..8t+7 and rows >= 72) never feed
    # garbage/NaN into the MXU contraction.  Done unconditionally (not
    # pl.when(b == 0)) so the batch axis can be "parallel": on v7x a core that
    # starts at b > 0 still gets a clean scratch.  ~16 vreg stores, negligible.
    tap_ref[...] = jnp.zeros_like(tap_ref)

    # --- 3x3 SAME conv: 9 rolled+masked taps stored to 8-aligned slots -------
    for kh in range(K):
        for kw in range(K):
            dh, dw = kh - 1, kw - 1
            s = dh * W + dw                               # flat neighbor offset
            if s == 0:
                shifted = x
            else:
                # shifted[p] = x[(p + s) mod HW]  (XLU lane rotation; wrapped
                # positions are all masked below, so wraparound is harmless)
                shifted = pltpu.roll(x, (-s) % HW, axis=1)
            valid = None
            for m in (row_ok[dh], col_ok[dw]):            # fold SAME zero padding in
                if m is not None:
                    valid = m if valid is None else jnp.logical_and(valid, m)
            if valid is not None:
                shifted = jnp.where(valid, shifted, 0.0)
            t = kh * K + kw
            # bf16 store into the tap slot; plain vst, no sublane broadcast.
            tap_ref[TAP_SLOT * t:TAP_SLOT * t + C_IN, :] = shifted.astype(jnp.bfloat16)

    # --- the whole contraction as ONE MXU matmul ------------------------------
    # w1 lanes >= 72 hold b1 / zeros; they multiply zeroed scratch rows -> no-op.
    w1 = p_ref[W1_ROW0:W1_ROW0 + C_OUT, :].astype(jnp.bfloat16)      # (8, 128)
    acc = jnp.dot(w1, tap_ref[...], preferred_element_type=jnp.float32)  # (8, HW) f32

    b1c = p_ref[W1_ROW0:W1_ROW0 + C_OUT, B1_LANE:B1_LANE + 1]        # (8, 1) f32
    acc = jnp.maximum(acc + b1c, 0.0)                     # fused bias + ReLU

    # Global average pool: one lane-axis sum * precomputed 1/(H*W).
    pooled = jnp.sum(acc, axis=1, keepdims=True) * (1.0 / HW)        # (C_OUT, 1)

    # Linear classifier in the padded lane space; lanes >= NUM_CLASSES stay 0
    # because the packed w2/b2 padding lanes are zero.
    w2p = p_ref[W2_ROW0:W2_ROW0 + C_OUT, :]                          # (C_OUT, 128)
    b2r = p_ref[B2_ROW:B2_ROW + 1, :]                                # (1, 128)
    logits = jnp.sum(pooled * w2p, axis=0, keepdims=True) + b2r      # (1, 128)

    # Lane-dense single-row store (no (8,128) sublane replication).
    o_ref[...] = logits


def run_engine(img_batch, packed_params):
    """Runs the Pallas 'engine' on an (N, C_IN, H, W) batch -> (N, NUM_CLASSES).

    One pallas_call with grid=(N,): the packed-param block has a constant
    index_map (DMA'd once, reused every step), amortizing launch + param DMA.
    """
    n = img_batch.shape[0]
    x = img_batch.reshape(n, C_IN, HW)                    # free reshape, lane-dense
    out = pl.pallas_call(
        engine_kernel,
        out_shape=jax.ShapeDtypeStruct((n, 1, LANES), jnp.float32),
        grid_spec=pltpu.PrefetchScalarGridSpec(
            num_scalar_prefetch=0,
            grid=(n,),
            in_specs=[
                pl.BlockSpec((None, C_IN, HW), lambda b: (b, 0, 0)),       # image b
                pl.BlockSpec((PACK_ROWS, LANES), lambda b: (0, 0)),        # params (const)
            ],
            out_specs=pl.BlockSpec((None, 1, LANES), lambda b: (b, 0, 0)),
            scratch_shapes=[pltpu.VMEM((TAP_ROWS, HW), jnp.bfloat16)],
        ),
        compiler_params=pltpu.CompilerParams(
            dimension_semantics=("parallel",)),           # 2 TCs split batch on v7x
    )(x, packed_params)
    return out[:, 0, 0:NUM_CLASSES]


def tensorrt_model_forward(img, packed_params):
    """Mirrors TensorrtModel.forward: unsqueeze(img, 0) then run the engine."""
    img_batch = img[None]                                 # torch.unsqueeze(img, 0)
    return run_engine(img_batch, packed_params)           # (1, NUM_CLASSES)


def make_params(key):
    k1, k2, k3, k4 = jax.random.split(key, 4)
    w1_hwio = 0.1 * jax.random.normal(k1, (K, K, C_IN, C_OUT), jnp.float32)
    b1 = 0.1 * jax.random.normal(k2, (C_OUT,), jnp.float32)
    w2 = 0.1 * jax.random.normal(k3, (C_OUT, NUM_CLASSES), jnp.float32)
    b2 = 0.1 * jax.random.normal(k4, (NUM_CLASSES,), jnp.float32)

    # w1 tap-major packing: lane 8*t + ci = w1[kh,kw,ci,co]  (matches the
    # 8-row-aligned tap slots of the in-kernel scratch).
    w1_t = jnp.transpose(w1_hwio.reshape(K * K, C_IN, C_OUT), (2, 0, 1))  # (C_OUT, 9, C_IN)
    w1_t = jnp.pad(w1_t, ((0, 0), (0, 0), (0, TAP_SLOT - C_IN)))          # (C_OUT, 9, 8)
    w1_t = w1_t.reshape(C_OUT, TAP_DATA_ROWS)                             # (C_OUT, 72)

    packed = jnp.zeros((PACK_ROWS, LANES), jnp.float32)   # zero padding lanes are load-bearing
    packed = packed.at[W1_ROW0:W1_ROW0 + C_OUT, 0:TAP_DATA_ROWS].set(w1_t)
    packed = packed.at[W1_ROW0:W1_ROW0 + C_OUT, B1_LANE].set(b1)
    packed = packed.at[W2_ROW0:W2_ROW0 + C_OUT, 0:NUM_CLASSES].set(w2)
    packed = packed.at[B2_ROW, 0:NUM_CLASSES].set(b2)

    return {
        "packed": packed,
        # NCHW/OIHW copies for the pure-JAX reference check.
        "w1_oihw": jnp.transpose(w1_hwio, (3, 2, 0, 1)),
        "b1": b1,
        "w2": w2,
        "b2": b2,
    }


def reference_engine(img_batch, params):
    """Pure-JAX f32 reference (PyTorch NCHW semantics) for correctness checks."""
    x = img_batch.astype(jnp.float32)                     # (N, C, H, W)
    y = lax.conv_general_dilated(
        x, params["w1_oihw"], window_strides=(1, 1), padding="SAME",
        dimension_numbers=("NCHW", "OIHW", "NCHW"))
    y = jax.nn.relu(y + params["b1"][None, :, None, None])
    pooled = y.mean(axis=(2, 3))                          # (N, C_OUT)
    return pooled @ params["w2"] + params["b2"][None, :]


if __name__ == "__main__":
    key = jax.random.PRNGKey(0)
    k_img, k_par, k_batch = jax.random.split(key, 3)
    params = make_params(k_par)

    # Tolerance is set for the bf16 MXU feed (inputs/weights rounded to bf16,
    # f32 accumulation); any tap/row packing bug would still produce O(1e-1)
    # errors and trip these asserts.
    TOL = dict(atol=1e-2, rtol=1e-2)

    # 1) forward() semantics: single CHW image, unsqueeze -> batch 1 -> engine.
    img = jax.random.normal(k_img, (C_IN, H, W), jnp.float32)
    fwd = jax.jit(tensorrt_model_forward)
    out = jax.block_until_ready(fwd(img, params["packed"]))
    ref = reference_engine(img[None], params)
    assert out.shape == (1, NUM_CLASSES)
    assert jnp.allclose(out, ref, **TOL), (out, ref)

    # 2) batched engine path: grid over batch, params DMA'd once, "parallel" axis.
    imgs = jax.random.normal(k_batch, (2, C_IN, H, W), jnp.float32)
    out_b = jax.block_until_ready(jax.jit(run_engine)(imgs, params["packed"]))
    ref_b = reference_engine(imgs, params)
    assert out_b.shape == (2, NUM_CLASSES)
    assert jnp.allclose(out_b, ref_b, **TOL), (out_b, ref_b)

    print("KERNEL_OK")
</pallas_src>

<mosaic_0001>
module attributes {stable_mosaic.version = 11 : i64} {
  func.func @engine_kernel(%arg0: i32, %arg1: memref<1x4x256xf32, #tpu.memory_space<vmem>>, %arg2: memref<24x128xf32, #tpu.memory_space<vmem>>, %arg3: memref<1x1x128xf32, #tpu.memory_space<vmem>>, %arg4: memref<128x256xbf16, #tpu.memory_space<vmem>>) attributes {dimension_semantics = [#tpu.dimension_semantics<parallel>], iteration_bounds = array<i64: 1>, scalar_prefetch = 0 : i64, scratch_operands = 1 : i64, tpu.core_type = #tpu.core_type<tc>, window_params = [{transform_indices = @transform_0, window_bounds = array<i64: 1, 4, 256>}, {pipeline_mode = #tpu.pipeline_mode<synchronous>, transform_indices = @transform_1, window_bounds = array<i64: 24, 128>}, {transform_indices = @transform_2, window_bounds = array<i64: 1, 1, 128>}]} {
    %c0 = arith.constant 0 : index
    %c0_0 = arith.constant 0 : index
    %c0_1 = arith.constant 0 : index
    %0 = vector.load %arg1[%c0, %c0_0, %c0_1] : memref<1x4x256xf32, #tpu.memory_space<vmem>>, vector<1x4x256xf32>
    %1 = vector.shape_cast %0 : vector<1x4x256xf32> to vector<4x256xf32>
    %2 = tpu.iota {dimensions = array<i32: 1>} : vector<4x256xi32>
    %c15_i32 = arith.constant 15 : i32
    %3 = vector.broadcast %c15_i32 : i32 to vector<4x256xi32>
    %4 = arith.andi %2, %3 : vector<4x256xi32>
    %c4_i32 = arith.constant 4 : i32
    %5 = vector.broadcast %c4_i32 : i32 to vector<4x256xi32>
    %6 = arith.shrsi %2, %5 : vector<4x256xi32>
    %c1_i32 = arith.constant 1 : i32
    %7 = vector.broadcast %c1_i32 : i32 to vector<4x256xi32>
    %8 = arith.cmpi sge, %6, %7 : vector<4x256xi32>
    %c14_i32 = arith.constant 14 : i32
    %9 = vector.broadcast %c14_i32 : i32 to vector<4x256xi32>
    %10 = arith.cmpi sle, %6, %9 : vector<4x256xi32>
    %c1_i32_2 = arith.constant 1 : i32
    %11 = vector.broadcast %c1_i32_2 : i32 to vector<4x256xi32>
    %12 = arith.cmpi sge, %4, %11 : vector<4x256xi32>
    %c14_i32_3 = arith.constant 14 : i32
    %13 = vector.broadcast %c14_i32_3 : i32 to vector<4x256xi32>
    %14 = arith.cmpi sle, %4, %13 : vector<4x256xi32>
    %cst = arith.constant 0.000000e+00 : bf16
    %15 = vector.broadcast %cst : bf16 to vector<128x256xbf16>
    %c0_4 = arith.constant 0 : index
    %c0_5 = arith.constant 0 : index
    %16 = vector.load %arg4[%c0_4, %c0_5] : memref<128x256xbf16, #tpu.memory_space<vmem>>, vector<128x256xbf16>
    tpu.vector_store %arg4[%c0_4, %c0_5], %15 {strides = array<i32>} : memref<128x256xbf16, #tpu.memory_space<vmem>>, vector<128x256xbf16>,
    %c17_i32 = arith.constant 17 : i32
    %17 = tpu.dynamic_rotate %1 by %c17_i32 dim 1 : vector<4x256xf32>, i32 -> vector<4x256xf32>
    %18 = arith.andi %8, %12 : vector<4x256xi1>
    %cst_6 = arith.constant 0.000000e+00 : f32
    %19 = vector.broadcast %cst_6 : f32 to vector<4x256xf32>
    %20 = arith.select %18, %17, %19 : vector<4x256xi1>, vector<4x256xf32>
    %21 = arith.truncf %20 : vector<4x256xf32> to vector<4x256xbf16>
    %c0_7 = arith.constant 0 : index
    %c0_8 = arith.constant 0 : index
    %22 = vector.load %arg4[%c0_7, %c0_8] : memref<128x256xbf16, #tpu.memory_space<vmem>>, vector<4x256xbf16>
    tpu.vector_store %arg4[%c0_7, %c0_8], %21 {strides = array<i32>} : memref<128x256xbf16, #tpu.memory_space<vmem>>, vector<4x256xbf16>,
    %c16_i32 = arith.constant 16 : i32
    %23 = tpu.dynamic_rotate %1 by %c16_i32 dim 1 : vector<4x256xf32>, i32 -> vector<4x256xf32>
    %cst_9 = arith.constant 0.000000e+00 : f32
    %24 = vector.broadcast %cst_9 : f32 to vector<4x256xf32>
    %25 = arith.select %8, %23, %24 : vector<4x256xi1>, vector<4x256xf32>
    %26 = arith.truncf %25 : vector<4x256xf32> to vector<4x256xbf16>
    %c8 = arith.constant 8 : index
    %c0_10 = arith.constant 0 : index
    %27 = vector.load %arg4[%c8, %c0_10] : memref<128x256xbf16, #tpu.memory_space<vmem>>, vector<4x256xbf16>
    tpu.vector_store %arg4[%c8, %c0_10], %26 {strides = array<i32>} : memref<128x256xbf16, #tpu.memory_space<vmem>>, vector<4x256xbf16>,
    %c15_i32_11 = arith.constant 15 : i32
    %28 = tpu.dynamic_rotate %1 by %c15_i32_11 dim 1 : vector<4x256xf32>, i32 -> vector<4x256xf32>
    %29 = arith.andi %8, %14 : vector<4x256xi1>
    %cst_12 = arith.constant 0.000000e+00 : f32
    %30 = vector.broadcast %cst_12 : f32 to vector<4x256xf32>
    %31 = arith.select %29, %28, %30 : vector<4x256xi1>, vector<4x256xf32>
    %32 = arith.truncf %31 : vector<4x256xf32> to vector<4x256xbf16>
    %c16 = arith.constant 16 : index
    %c0_13 = arith.constant 0 : index
    %33 = vector.load %arg4[%c16, %c0_13] : memref<128x256xbf16, #tpu.memory_space<vmem>>, vector<4x256xbf16>
    tpu.vector_store %arg4[%c16, %c0_13], %32 {strides = array<i32>} : memref<128x256xbf16, #tpu.memory_space<vmem>>, vector<4x256xbf16>,
    %c1_i32_14 = arith.constant 1 : i32
    %34 = tpu.dynamic_rotate %1 by %c1_i32_14 dim 1 : vector<4x256xf32>, i32 -> vector<4x256xf32>
    %cst_15 = arith.constant 0.000000e+00 : f32
    %35 = vector.broadcast %cst_15 : f32 to vector<4x256xf32>
    %36 = arith.select %12, %34, %35 : vector<4x256xi1>, vector<4x256xf32>
    %37 = arith.truncf %36 : vector<4x256xf32> to vector<4x256xbf16>
    %c24 = arith.constant 24 : index
    %c0_16 = arith.constant 0 : index
    %38 = vector.load %arg4[%c24, %c0_16] : memref<128x256xbf16, #tpu.memory_space<vmem>>, vector<4x256xbf16>
    tpu.vector_store %arg4[%c24, %c0_16], %37 {strides = array<i32>} : memref<128x256xbf16, #tpu.memory_space<vmem>>, vector<4x256xbf16>,
    %39 = arith.truncf %1 : vector<4x256xf32> to vector<4x256xbf16>
    %c32 = arith.constant 32 : index
    %c0_17 = arith.constant 0 : index
    %40 = vector.load %arg4[%c32, %c0_17] : memref<128x256xbf16, #tpu.memory_space<vmem>>, vector<4x256xbf16>
    tpu.vector_store %arg4[%c32, %c0_17], %39 {strides = array<i32>} : memref<128x256xbf16, #tpu.memory_space<vmem>>, vector<4x256xbf16>,
    %c255_i32 = arith.constant 255 : i32
    %41 = tpu.dynamic_rotate %1 by %c255_i32 dim 1 : vector<4x256xf32>, i32 -> vector<4x256xf32>
    %cst_18 = arith.constant 0.000000e+00 : f32
    %42 = vector.broadcast %cst_18 : f32 to vector<4x256xf32>
    %43 = arith.select %14, %41, %42 : vector<4x256xi1>, vector<4x256xf32>
    %44 = arith.truncf %43 : vector<4x256xf32> to vector<4x256xbf16>
    %c40 = arith.constant 40 : index
    %c0_19 = arith.constant 0 : index
    %45 = vector.load %arg4[%c40, %c0_19] : memref<128x256xbf16, #tpu.memory_space<vmem>>, vector<4x256xbf16>
    tpu.vector_store %arg4[%c40, %c0_19], %44 {strides = array<i32>} : memref<128x256xbf16, #tpu.memory_space<vmem>>, vector<4x256xbf16>,
    %c241_i32 = arith.constant 241 : i32
    %46 = tpu.dynamic_rotate %1 by %c241_i32 dim 1 : vector<4x256xf32>, i32 -> vector<4x256xf32>
    %47 = arith.andi %10, %12 : vector<4x256xi1>
    %cst_20 = arith.constant 0.000000e+00 : f32
    %48 = vector.broadcast %cst_20 : f32 to vector<4x256xf32>
    %49 = arith.select %47, %46, %48 : vector<4x256xi1>, vector<4x256xf32>
    %50 = arith.truncf %49 : vector<4x256xf32> to vector<4x256xbf16>
    %c48 = arith.constant 48 : index
    %c0_21 = arith.constant 0 : index
    %51 = vector.load %arg4[%c48, %c0_21] : memref<128x256xbf16, #tpu.memory_space<vmem>>, vector<4x256xbf16>
    tpu.vector_store %arg4[%c48, %c0_21], %50 {strides = array<i32>} : memref<128x256xbf16, #tpu.memory_space<vmem>>, vector<4x256xbf16>,
    %c240_i32 = arith.constant 240 : i32
    %52 = tpu.dynamic_rotate %1 by %c240_i32 dim 1 : vector<4x256xf32>, i32 -> vector<4x256xf32>
    %cst_22 = arith.constant 0.000000e+00 : f32
    %53 = vector.broadcast %cst_22 : f32 to vector<4x256xf32>
    %54 = arith.select %10, %52, %53 : vector<4x256xi1>, vector<4x256xf32>
    %55 = arith.truncf %54 : vector<4x256xf32> to vector<4x256xbf16>
    %c56 = arith.constant 56 : index
    %c0_23 = arith.constant 0 : index
    %56 = vector.load %arg4[%c56, %c0_23] : memref<128x256xbf16, #tpu.memory_space<vmem>>, vector<4x256xbf16>
    tpu.vector_store %arg4[%c56, %c0_23], %55 {strides = array<i32>} : memref<128x256xbf16, #tpu.memory_space<vmem>>, vector<4x256xbf16>,
    %c239_i32 = arith.constant 239 : i32
    %57 = tpu.dynamic_rotate %1 by %c239_i32 dim 1 : vector<4x256xf32>, i32 -> vector<4x256xf32>
    %58 = arith.andi %10, %14 : vector<4x256xi1>
    %cst_24 = arith.constant 0.000000e+00 : f32
    %59 = vector.broadcast %cst_24 : f32 to vector<4x256xf32>
    %60 = arith.select %58, %57, %59 : vector<4x256xi1>, vector<4x256xf32>
    %61 = arith.truncf %60 : vector<4x256xf32> to vector<4x256xbf16>
    %c64 = arith.constant 64 : index
    %c0_25 = arith.constant 0 : index
    %62 = vector.load %arg4[%c64, %c0_25] : memref<128x256xbf16, #tpu.memory_space<vmem>>, vector<4x256xbf16>
    tpu.vector_store %arg4[%c64, %c0_25], %61 {strides = array<i32>} : memref<128x256xbf16, #tpu.memory_space<vmem>>, vector<4x256xbf16>,
    %c0_26 = arith.constant 0 : index
    %c0_27 = arith.constant 0 : index
    %63 = vector.load %arg2[%c0_26, %c0_27] : memref<24x128xf32, #tpu.memory_space<vmem>>, vector<8x128xf32>
    %64 = arith.truncf %63 : vector<8x128xf32> to vector<8x128xbf16>
    %c0_28 = arith.constant 0 : index
    %c0_29 = arith.constant 0 : index
    %65 = vector.load %arg4[%c0_28, %c0_29] : memref<128x256xbf16, #tpu.memory_space<vmem>>, vector<128x256xbf16>
    %cst_30 = arith.constant dense<0.000000e+00> : vector<8x256xf32>
    %66 = tpu.matmul %64, %65, %cst_30 {dimension_numbers = #tpu.dot_dimension_numbers<[1], [0], [0], [1], [0, 0, 1, 1], [], []>} : vector<8x128xbf16>, vector<128x256xbf16>, vector<8x256xf32> -> vector<8x256xf32>
    %c0_31 = arith.constant 0 : index
    %c72 = arith.constant 72 : index
    %67 = vector.load %arg2[%c0_31, %c72] : memref<24x128xf32, #tpu.memory_space<vmem>>, vector<8x1xf32>
    %68 = vector.broadcast %67 : vector<8x1xf32> to vector<8x256xf32>
    %69 = arith.addf %66, %68 : vector<8x256xf32>
    %cst_32 = arith.constant 0.000000e+00 : f32
    %70 = vector.broadcast %cst_32 : f32 to vector<8x256xf32>
    %71 = arith.maximumf %69, %70 : vector<8x256xf32>
    %cst_33 = arith.constant dense<0.000000e+00> : vector<8xf32>
    %72 = vector.multi_reduction <add>, %71, %cst_33 [1] : vector<8x256xf32> to vector<8xf32>
    %73 = vector.shape_cast %72 : vector<8xf32> to vector<8x1xf32>
    %cst_34 = arith.constant 3.906250e-03 : f32
    %74 = vector.broadcast %cst_34 : f32 to vector<8x1xf32>
    %75 = arith.mulf %73, %74 : vector<8x1xf32>
    %c8_35 = arith.constant 8 : index
    %c0_36 = arith.constant 0 : index
    %76 = vector.load %arg2[%c8_35, %c0_36] : memref<24x128xf32, #tpu.memory_space<vmem>>, vector<8x128xf32>
    %c16_37 = arith.constant 16 : index
    %c0_38 = arith.constant 0 : index
    %77 = vector.load %arg2[%c16_37, %c0_38] : memref<24x128xf32, #tpu.memory_space<vmem>>, vector<1x128xf32>
    %78 = vector.broadcast %75 : vector<8x1xf32> to vector<8x128xf32>
    %79 = arith.mulf %78, %76 : vector<8x128xf32>
    %cst_39 = arith.constant dense<0.000000e+00> : vector<128xf32>
    %80 = vector.multi_reduction <add>, %79, %cst_39 [0] : vector<8x128xf32> to vector<128xf32>
    %81 = vector.shape_cast %80 : vector<128xf32> to vector<1x128xf32>
    %82 = arith.addf %81, %77 : vector<1x128xf32>
    %c0_40 = arith.constant 0 : index
    %c0_41 = arith.constant 0 : index
    %c0_42 = arith.constant 0 : index
    %83 = vector.load %arg3[%c0_40, %c0_41, %c0_42] : memref<1x1x128xf32, #tpu.memory_space<vmem>>, vector<1x1x128xf32>
    %84 = vector.shape_cast %83 : vector<1x1x128xf32> to vector<1x128xf32>
    %85 = vector.shape_cast %82 : vector<1x128xf32> to vector<1x1x128xf32>
    tpu.vector_store %arg3[%c0_40, %c0_41, %c0_42], %85 {strides = array<i32>} : memref<1x1x128xf32, #tpu.memory_space<vmem>>, vector<1x1x128xf32>,
    return
  }
  func.func @transform_0(%arg0: i32) -> (i32, i32, i32) {
    %c0_i32 = arith.constant 0 : i32
    %c0_i32_0 = arith.constant 0 : i32
    %c0_i32_1 = arith.constant 0 : i32
    return %arg0, %c0_i32, %c0_i32_0 : i32, i32, i32
  }
  func.func @transform_1(%arg0: i32) -> (i32, i32) {
    %c0_i32 = arith.constant 0 : i32
    %c0_i32_0 = arith.constant 0 : i32
    %c0_i32_1 = arith.constant 0 : i32
    return %c0_i32, %c0_i32_0 : i32, i32
  }
  func.func @transform_2(%arg0: i32) -> (i32, i32, i32) {
    %c0_i32 = arith.constant 0 : i32
    %c0_i32_0 = arith.constant 0 : i32
    %c0_i32_1 = arith.constant 0 : i32
    return %arg0, %c0_i32, %c0_i32_0 : i32, i32, i32
  }
}

</mosaic_0001>

<bundles_post_ra>
// kernel: tensorrt_model_forward.1
= control target key start
LH: loop header
LB: loop body
LE: loop exit
PB: predicated region body
PF: predicated region fallthrough
CT: control target
= control target key end

     0   :  { %v465_v1 = vmov 0   ;;  %s467_s11 = smov 112   ;;  %s468_s12 = smov 113   ;;  %v474_v8 = vmov 72   ;;  %v13_v9 = vlaneseq  ;;  %s673_s0 = inlined_call_operand.vmem [shape: f32[1,4,256], index: 0, kind: input, shape index: {}]   ;;  %s674_s1 = inlined_call_operand.vmem [shape: f32[24,128], index: 1, kind: input, shape index: {}]   ;;  %s675_s2 = inlined_call_operand.vmem [shape: f32[1,1,128], index: 2, kind: output, shape index: {}]  }
   0x1   :  { %v12_v0 = vld [vmem:[%s673_s0] sm:$0xff]  ;;  %36 = vst [vmem:[#allocation2 + $0x40] sm:$0xff] %v465_v1  ;;  %28 = vst [vmem:[#allocation2 + $0x30] sm:$0xff] %v465_v1  ;;  %v397_v2 = vcombine.high %v465_v1, %v465_v1  ;;  %v396_v3 = vcombine.low %v465_v1, %v465_v1  ;;  %343 = vmatprep.mubr.bf16.mxu0 %v465_v1  ;;  %s466_s0 = smov 111   ;;  %s469_s13 = smov 127   ;;  %457 = vset.pattern.permute.xlu0 %v474_v8 }
   0x2   :  { %29 = vst [vmem:[#allocation2] sm:$0xff] %v465_v1  ;;  %30 = vst [vmem:[#allocation2 + $0x58] sm:$0xff] %v465_v1  ;;  %v45_v4 = vcombine.high %v12_v0, %v12_v0  ;;  %s470_s14 = smov 1   ;;  %s471_s15 = smov 15   ;;  %v510_v7 = vld [vmem:[%s674_s1] sm:$0xff]  ;;  %v513_v10 = vand.u32 127, %v13_v9 }
   0x3   :  { %31 = vst [vmem:[#allocation2 + $0x18] sm:$0xff] %v465_v1  ;;  %32 = vst [vmem:[#allocation2 + $0x50] sm:$0xff] %v465_v1  ;;  %311 = vmatprep.subr.bf16.mxu0 %v397_v2  ;;  %s472_s16 = smov 16   ;;  %s473_s17 = smov 17  }
   0x4   :  { %33 = vst [vmem:[#allocation2 + $0x68] sm:$0xff] %v465_v1  ;;  %34 = vst [vmem:[#allocation2 + $0x8] sm:$0xff] %v465_v1  ;;  %v417_v5 = vpack.i.bf16 %v45_v4, %v12_v0  ;;  %312 = vmatpush1.bf16.msra.mxu0 %v396_v3  ;;  %v402_v6 = vpack.c.bf16 %v45_v4, %v12_v0  ;;  %v15_v11 = vadd.s32 128, %v513_v10  ;;  %v16_v12 = vand.u32 15, %v513_v10 }
   0x5   :  { %35 = vst [vmem:[#allocation2 + $0x48] sm:$0xff] %v465_v1  ;;  %313 = vmatprep.subr.bf16.mxu0 %v397_v2  ;;  %v18_v13 = vshra.s32 %v513_v10, 4  ;;  %vm192_vm4 = vcmp.lt.s32.totalorder %v513_v10, 111  ;;  %vm174_vm6 = vcmp.lt.s32.totalorder %v513_v10, 112  ;;  %vm154_vm10 = vcmp.lt.s32.totalorder %v513_v10, 113 }
   0x6   :  { %418 = vrot.lane.b32.xlu0 %v417_v5, %s466_s0  ;;  %428 = vrot.lane.b32.xlu1 %v417_v5, %s467_s11  ;;  %131 = vst [vmem:[#allocation2 + $0x50] sm:$0x33] %v402_v6  ;;  %v17_v14 = vand.u32 15, %v15_v11  ;;  %v19_v15 = vshra.s32 %v15_v11, 4  ;;  %vm522_vm1 = vcmp.le.s32.totalorder %v16_v12, 14  ;;  %vm540_vm7 = vcmp.ge.s32.totalorder %v16_v12, 1 }
   0x7   :  { %vm518_vm0 = vcmp.le.s32.totalorder %v18_v13, 14  ;;  %vm136_vm11 = vcmp.lt.s32.totalorder %v513_v10, 127  ;;  %vm109_vm14 = vcmp.lt.s32.totalorder %v513_v10, 1  ;;  %vm572_vm15 = vcmp.ge.s32.totalorder %v18_v13, 1 }
   0x8   :  { %314 = vmatpush1.bf16.msra.mxu0 %v396_v3  ;;  %vm526_vm2 = vcmp.le.s32.totalorder %v19_v15, 14  ;;  %vm530_vm3 = vcmp.le.s32.totalorder %v17_v14, 14  ;;  %vm195_vm5 = vmand %vm518_vm0, %vm522_vm1  ;;  %vm548_vm9 = vcmp.ge.s32.totalorder %v17_v14, 1 }
   0x9   :  { %315 = vmatprep.subr.bf16.mxu0 %v397_v2  ;;  %vm196_vm8 = vmand %vm526_vm2, %vm530_vm3 }
   0xa   :  { %423 = vrot.lane.b32.xlu0 %v417_v5, %s468_s12  ;;  %433 = vrot.lane.b32.xlu1 %v417_v5, %s469_s13  ;;  %vm157_vm12 = vmand %vm518_vm0, %vm540_vm7 }
   0xb   :  { %vm158_vm13 = vmand %vm526_vm2, %vm548_vm9 }
   0xc   :  { %316 = vmatpush1.bf16.msra.mxu0 %v396_v3 }
   0xe   :  { %443 = vrot.lane.b32.xlu1 %v417_v5, %s470_s14  ;;  %438 = vrot.lane.b32.xlu0 %v417_v5, %s471_s15 }
  0x12   :  { %453 = vrot.lane.b32.xlu1 %v417_v5, %s472_s16  ;;  %448 = vrot.lane.b32.xlu0 %v417_v5, %s473_s17 }
  0x16   :  { %228 = vperm.xlu0 %457, %v510_v7  }
  0x78   :  { %v419_v20 = vpop.permute.xlu0 %418  ;;  %v429_v21 = vpop.permute.xlu1 %428 }
  0x79   :  { %v421_v23 = vunpack.i.h.bf16 %v419_v20  ;;  %v420_v24 = vunpack.i.l.bf16 %v419_v20  ;;  %v431_v25 = vunpack.i.h.bf16 %v429_v21  ;;  %v430_v26 = vunpack.i.l.bf16 %v429_v21 }
  0x7b   :  { %v193_v28 = vsel %vm192_vm4, %v420_v24, %v421_v23  ;;  %v194_v29 = vsel %vm192_vm4, %v421_v23, %v420_v24  ;;  %v175_v30 = vsel %vm174_vm6, %v430_v26, %v431_v25  ;;  %v176_v31 = vsel %vm174_vm6, %v431_v25, %v430_v26 }
  0x7c   :  { %v197_v32 = vsel %vm195_vm5, %v193_v28, 0.0  ;;  %v198_v33 = vsel %vm196_vm8, %v194_v29, 0.0  ;;  %v177_v34 = vsel %vm518_vm0, %v175_v30, 0.0  ;;  %v178_v35 = vsel %vm526_vm2, %v176_v31, 0.0  ;;  %v424_v36 = vpop.permute.xlu0 %423  ;;  %v434_v37 = vpop.permute.xlu1 %433  ;;  %vm92_vm0 = vmand %vm572_vm15, %vm522_vm1 }
  0x7d   :  { %v406_v38 = vpack.c.bf16 %v198_v33, %v197_v32  ;;  %v405_v39 = vpack.c.bf16 %v178_v35, %v177_v34  ;;  %v426_v40 = vunpack.i.h.bf16 %v424_v36  ;;  %v425_v41 = vunpack.i.l.bf16 %v424_v36 }
  0x7e   :  { %v436_v42 = vunpack.i.h.bf16 %v434_v37  ;;  %v435_v43 = vunpack.i.l.bf16 %v434_v37  ;;  %vm580_vm4 = vcmp.ge.s32.totalorder %v19_v15, 1  ;;  %vm89_vm2 = vcmp.lt.s32.totalorder %v513_v10, 15 }
  0x7f   :  { %207 = vst [vmem:[#allocation2 + $0x40] sm:$0x33] %v406_v38  ;;  %187 = vst [vmem:[#allocation2 + $0x48] sm:$0x33] %v405_v39  ;;  %v155_v45 = vsel %vm154_vm10, %v425_v41, %v426_v40  ;;  %v156_v46 = vsel %vm154_vm10, %v426_v40, %v425_v41  ;;  %vm71_vm6 = vcmp.lt.s32.totalorder %v513_v10, 16  ;;  %vm51_vm8 = vcmp.lt.s32.totalorder %v513_v10, 17 }
  0x80   :  { %v159_v48 = vsel %vm157_vm12, %v155_v45, 0.0  ;;  %v160_v49 = vsel %vm158_vm13, %v156_v46, 0.0  ;;  %v137_v50 = vsel %vm136_vm11, %v435_v43, %v436_v42  ;;  %v138_v51 = vsel %vm136_vm11, %v436_v42, %v435_v43  ;;  %v444_v52 = vpop.permute.xlu1 %443  ;;  %v439_v53 = vpop.permute.xlu0 %438  ;;  %vm93_vm5 = vmand %vm580_vm4, %vm530_vm3 }
  0x81   :  { %v404_v54 = vpack.c.bf16 %v160_v49, %v159_v48  ;;  %v139_v55 = vsel %vm522_vm1, %v137_v50, 0.0  ;;  %v140_v56 = vsel %vm530_vm3, %v138_v51, 0.0  ;;  %v446_v57 = vunpack.i.h.bf16 %v444_v52  ;;  %vm54_vm10 = vmand %vm572_vm15, %vm540_vm7  ;;  %v358_v51 = vld [vmem:[%s674_s1 + $0x8] sm:$0xff] }
  0x82   :  { %v403_v58 = vpack.c.bf16 %v140_v56, %v139_v55  ;;  %v445_v59 = vunpack.i.l.bf16 %v444_v52  ;;  %v441_v60 = vunpack.i.h.bf16 %v439_v53  ;;  %v440_v61 = vunpack.i.l.bf16 %v439_v53  ;;  %vm55_vm1 = vmand %vm580_vm4, %vm548_vm9 }
  0x83   :  { %169 = vst [vmem:[#allocation2 + $0x8] sm:$0x33] %v404_v54  ;;  %v209_v40 = vpack.c.bf16 %v510_v7, %v510_v7 }
  0x84   :  { %149 = vst [vmem:[#allocation2 + $0x68] sm:$0x33] %v403_v58  ;;  %v110_v62 = vsel %vm109_vm14, %v445_v59, %v446_v57  ;;  %v111_v63 = vsel %vm109_vm14, %v446_v57, %v445_v59  ;;  %v90_v0 = vsel %vm89_vm2, %v440_v61, %v441_v60  ;;  %v91_v2 = vsel %vm89_vm2, %v441_v60, %v440_v61  ;;  %v454_v3 = vpop.permute.xlu1 %453  ;;  %v449_v4 = vpop.permute.xlu0 %448  ;;  %v359_v59 = vld [vmem:[%s674_s1 + $0x10] sm:$0x1] }
  0x85   :  { %v112_v5 = vsel %vm540_vm7, %v111_v63, 0.0  ;;  %v113_v6 = vsel %vm548_vm9, %v110_v62, 0.0  ;;  %v94_v8 = vsel %vm92_vm0, %v91_v2, 0.0  ;;  %v95_v9 = vsel %vm93_vm5, %v90_v0, 0.0 }
  0x86   :  { %v401_v11 = vpack.c.bf16 %v113_v6, %v112_v5  ;;  %v400_v12 = vpack.c.bf16 %v95_v9, %v94_v8  ;;  %v456_v13 = vunpack.i.h.bf16 %v454_v3  ;;  %v455_v14 = vunpack.i.l.bf16 %v454_v3  ;;  %v218_v15 = vld [vmem:[#allocation2 + $0x40] sm:$0xff]  ;;  %v217_v23 = vld [vmem:[#allocation2 + $0x48] sm:$0xff] }
  0x87   :  { %v451_v16 = vunpack.i.h.bf16 %v449_v4  ;;  %v450_v17 = vunpack.i.l.bf16 %v449_v4  ;;  %v391_v18 = vcombine.high %v218_v15, %v465_v1  ;;  %v390_v19 = vcombine.low %v218_v15, %v465_v1 }
  0x88   :  { %122 = vst [vmem:[#allocation2 + $0x18] sm:$0x33] %v401_v11  ;;  %104 = vst [vmem:[#allocation2 + $0x58] sm:$0x33] %v400_v12  ;;  %v72_v20 = vsel %vm71_vm6, %v455_v14, %v456_v13  ;;  %v73_v21 = vsel %vm71_vm6, %v456_v13, %v455_v14 }
  0x89   :  { %v74_v24 = vsel %vm572_vm15, %v73_v21, 0.0  ;;  %v75_v25 = vsel %vm580_vm4, %v72_v20, 0.0  ;;  %v52_v26 = vsel %vm51_vm8, %v450_v17, %v451_v16  ;;  %v53_v1 = vsel %vm51_vm8, %v451_v16, %v450_v17  ;;  %317 = vmatprep.subr.bf16.mxu0 %v391_v18 }
  0x8a   :  { %v399_v28 = vpack.c.bf16 %v75_v25, %v74_v24  ;;  %v56_v29 = vsel %vm54_vm10, %v53_v1, 0.0  ;;  %v57_v30 = vsel %vm55_vm1, %v52_v26, 0.0  ;;  %318 = vmatpush1.bf16.msra.mxu0 %v390_v19  ;;  %v216_v31 = vld [vmem:[#allocation2 + $0x8] sm:$0xff] }
  0x8b   :  { %v398_v32 = vpack.c.bf16 %v57_v30, %v56_v29  ;;  %v389_v33 = vcombine.high %v216_v31, %v217_v23  ;;  %v388_v10 = vcombine.low %v216_v31, %v217_v23  ;;  %v459_v34 = vld [vmem:[#allocation2 + $0x54] ss:$24 sps:$4 sm:$0xff]   ;;  %v461_v36 = vld [vmem:[#allocation2 + $0x50] ss:$24 sps:$4 sm:$0xff]  }
  0x8c   :  { %84 = vst [vmem:[#allocation2] sm:$0x33] %v399_v28 }
  0x8d   :  { %66 = vst [vmem:[#allocation2 + $0x30] sm:$0x33] %v398_v32  ;;  %319 = vmatprep.subr.bf16.mxu0 %v389_v33 }
  0x8e   :  { %320 = vmatpush1.bf16.msra.mxu0 %v388_v10 }
  0x8f   :  { %321 = vmatprep.subr.bf16.mxu0 %v459_v34  ;;  %v212_v22 = vld [vmem:[#allocation2 + $0x58] sm:$0xff] }
  0x90   :  { %v213_v35 = vld [vmem:[#allocation2 + $0x18] sm:$0xff] }
  0x91   :  { %v385_v37 = vcombine.high %v212_v22, %v213_v35  ;;  %v384_v38 = vcombine.low %v212_v22, %v213_v35  ;;  %v229_v41 = vpop.permute.xlu0 %228 }
  0x92   :  { %322 = vmatpush1.bf16.msra.mxu0 %v461_v36 }
  0x93   :  { %323 = vmatprep.subr.bf16.mxu0 %v385_v37 }
  0x94   :  { %v462_v27 = vld [vmem:[#allocation2 + $0x34] ss:$-48 sps:$4 sm:$0xff]   ;;  %v464_v39 = vld [vmem:[#allocation2 + $0x30] ss:$-48 sps:$4 sm:$0xff]  }
  0x96   :  { %324 = vmatpush1.bf16.msra.mxu0 %v384_v38 }
  0x97   :  { %325 = vmatprep.subr.bf16.mxu0 %v462_v27 }
  0x9a   :  { %326 = vmatpush1.bf16.msra.mxu0 %v464_v39 }
  0x9d   :  { %344 = vmatmul.mubr.bf16.vlgmr.msra.gmra.mxu0 %v209_v40 }
 0x15d   :  { %v345_v42 = vpop.f32.mrf.mxu0 }
 0x15e   :  { %v346_v43 = vadd.f32 %v345_v42, %v229_v41 }
 0x15f   :  { %v347_v44 = vpop.f32.mrf.mxu0 }
 0x160   :  { %v348_v45 = vadd.f32 %v347_v44, %v229_v41  ;;  %v352_v47 = vmax.f32 %v346_v43, 0.0 }
 0x161   :  { %v349_v46 = vpop.f32.mrf.mxu0 }
 0x162   :  { %v353_v48 = vmax.f32 %v348_v45, 0.0 }
 0x163   :  { %v350_v49 = vpop.f32.mrf.mxu0 }
 0x164   :  { %v354_v50 = vadd.f32 %v353_v48, %v352_v47 }
 0x166   :  { %355 = vadd.xlane.f32.xlu1 %v354_v50 }
 0x1ef   :  { %v356_v52 = vpop.xlane.xlu1 %355 }
 0x1f0   :  { %v357_v53 = vmul.f32 0.00390625, %v356_v52 }
 0x1f2   :  { %v360_v7 = vmul.f32 %v358_v51, %v357_v53 }
 0x1f4   :  { %v361_v54 = vrot.slane %v360_v7, 4 }
 0x1f6   :  { %v362_v55 = vadd.f32 %v361_v54, %v360_v7 }
 0x1f8   :  { %v363_v56 = vrot.slane %v362_v55, 2 }
 0x1fa   :  { %v364_v57 = vadd.f32 %v363_v56, %v362_v55 }
 0x1fc   :  { %v365_v58 = vrot.slane %v364_v57, 1 }
 0x1fe   :  { %v366_v60 = vadd.f32 %v365_v58, %v364_v57 }
 0x200   :  { %v367_v61 = vadd.f32 %v366_v60, %v359_v59 }
 0x202   :  { %368 = vst [vmem:[%s675_s2] sm:$0x1] %v367_v61 }

</bundles_post_ra>
